<compile_context>
chip_gen: v7x
topology: tpu7x:2x2x1
jax: 0.10.0
libtpu: 0.0.40
codegen_flags: <defaults>
</compile_context>

<pallas_src>
import jax
import jax.numpy as jnp
from jax.experimental import pallas as pl
from jax.experimental.pallas import tpu as pltpu


LEAD = 8  # leading halo rows per batch segment: >= pad and a multiple of 8


def _round_up(x, m):
    return (x + m - 1) // m * m


# ---------------------------------------------------------------------------
# Fused Pallas kernel
# ---------------------------------------------------------------------------

def _make_encoder_kernel(channels, kernel, ratios, batch, lengths, segs):
    pad = kernel // 2
    n_layers = len(ratios)
    n_scratch = min(2, n_layers - 1)          # ping-pong activation buffers
    neg_slope = 0.01                          # nn.LeakyReLU default
    eps = 1e-5                                # nn.BatchNorm1d default

    def kern(*refs):
        # ---- unpack: x, per-layer params, output, ping-pong scratches -------
        idx = 0
        x_ref = refs[idx]; idx += 1
        layers = []
        for i in range(n_layers):
            w_ref, b_ref = refs[idx], refs[idx + 1]; idx += 2
            if i != n_layers - 1:
                g_ref, beta_ref = refs[idx], refs[idx + 1]; idx += 2
            else:
                g_ref = beta_ref = None
            layers.append((w_ref, b_ref, g_ref, beta_ref))
        o_ref = refs[idx]; idx += 1
        act_refs = refs[idx:]

        cur_ref = x_ref                       # (batch * segs[0], C0) slab
        for i in range(n_layers):
            w_ref, b_ref, g_ref, beta_ref = layers[i]
            c_in = channels[i]
            c_out = channels[i + 1]
            stride = ratios[i]
            last = i == n_layers - 1
            seg_in = segs[i]
            l_out = lengths[i + 1]

            # --- strided lane-packed im2col: (batch*l_out, K*C_in) bf16 ------
            # Tap k of output row j needs padded-input row j*stride + k; the
            # stride is folded into the load so only l_out rows are touched.
            rows = []
            for bn in range(batch):
                start0 = bn * seg_in + LEAD - pad          # static Python int
                taps = []
                for k in range(kernel):
                    if stride > 1:
                        win = cur_ref[pl.ds(start0 + k, l_out, stride=stride),
                                      :c_in]
                    else:
                        win = cur_ref[pl.ds(start0 + k, l_out), :c_in]
                    taps.append(win)
                rows.append(jnp.concatenate(taps, axis=1))
            xcol = jnp.concatenate(rows, axis=0).astype(jnp.bfloat16)

            # --- one MXU matmul per layer (bf16 in, f32 accumulate) ----------
            y = jnp.dot(xcol, w_ref[...],
                        preferred_element_type=jnp.float32) + b_ref[...]

            if last:
                # lane-dense store: C_out is zero-padded to 128 lanes already
                o_ref[...] = y.astype(o_ref.dtype)
                continue

            y = jnp.where(y >= 0.0, y, neg_slope * y)      # LeakyReLU (f32)

            # --- training-mode BatchNorm1d over (batch, length) --------------
            cnt = float(batch * l_out)
            s = jnp.sum(y, axis=0, keepdims=True)
            ss = jnp.sum(y * y, axis=0, keepdims=True)
            mean = s / cnt
            var = jnp.maximum(ss / cnt - mean * mean, 0.0)  # clamp -> no NaN
            scale = jax.lax.rsqrt(var + eps) * g_ref[...]
            shift = beta_ref[...] - mean * scale
            y = y * scale + shift

            # --- store into ping-pong scratch; zero ONLY the halo rows -------
            nxt = act_refs[i % n_scratch]
            seg_out = segs[i + 1]
            halo = jnp.zeros((pad, c_out), jnp.float32)
            for bn in range(batch):
                base = bn * seg_out                        # multiple of 8
                nxt[pl.ds(base + LEAD - pad, pad), :c_out] = halo
                nxt[pl.ds(base + LEAD, l_out), :c_out] = (
                    y[bn * l_out:(bn + 1) * l_out])        # 8-aligned start
                nxt[pl.ds(base + LEAD + l_out, pad), :c_out] = halo
            cur_ref = nxt

    return kern


# ---------------------------------------------------------------------------
# One-time parameter relayout
# ---------------------------------------------------------------------------

def prepare_params(params, channels, kernel, ratios):
    """Conv weights (C_out, C_in, K) -> bf16 (K*C_in, C_out) im2col matrices.

    The last layer's weight/bias are zero-padded to a 128-lane output so the
    kernel's final store is lane-dense (unmasked vst)."""
    n_layers = len(ratios)
    out_lanes = _round_up(channels[-1], 128)
    prepared = []
    for i in range(n_layers):
        c_in, c_out = channels[i], channels[i + 1]
        w = params[f"conv{i}_w"]                              # (C_out, C_in, K)
        w2d = jnp.transpose(w, (2, 1, 0)).reshape(kernel * c_in, c_out)
        b = params[f"conv{i}_b"].reshape(1, c_out).astype(jnp.float32)
        if i == n_layers - 1:
            w2d = jnp.pad(w2d, ((0, 0), (0, out_lanes - c_out)))
            b = jnp.pad(b, ((0, 0), (0, out_lanes - c_out)))
        prepared.append(w2d.astype(jnp.bfloat16))
        prepared.append(b)
        if i != n_layers - 1:
            prepared.append(params[f"bn{i}_g"].reshape(1, -1).astype(jnp.float32))
            prepared.append(params[f"bn{i}_b"].reshape(1, -1).astype(jnp.float32))
    return tuple(prepared)


# ---------------------------------------------------------------------------
# Wrapper (single jitted forward, single pallas_call)
# ---------------------------------------------------------------------------

def make_conv_encoder(channels, kernel, ratios):
    n_layers = len(ratios)
    pad = kernel // 2
    out_lanes = _round_up(channels[-1], 128)

    def forward(x, prepared):
        n, _, l = x.shape
        lengths = [l]
        for r in ratios:
            lengths.append((lengths[-1] + 2 * pad - kernel) // r + 1)
        # 8-aligned per-batch activation segments with an 8-row leading halo
        segs = [_round_up(LEAD + lengths[i] + pad, 8) for i in range(n_layers)]

        # channels-last + aligned zero padding, flattened into a 2-D slab
        x_cl = jnp.transpose(x, (0, 2, 1))                     # (N, L, C0)
        x_p = jnp.pad(x_cl, ((0, 0), (LEAD, segs[0] - LEAD - l), (0, 0)))
        x2d = x_p.reshape(n * segs[0], channels[0])

        # two max-sized ping-pong buffers shared by all intermediate layers
        n_scratch = min(2, n_layers - 1)
        scratch = []
        if n_scratch:
            max_rows = max(n * segs[i] for i in range(1, n_layers))
            max_ch = max(channels[i] for i in range(1, n_layers))
            scratch = [pltpu.VMEM((max_rows, max_ch), jnp.float32)
                       for _ in range(n_scratch)]

        vmem = pl.BlockSpec(memory_space=pltpu.MemorySpace.VMEM)
        kern = _make_encoder_kernel(channels, kernel, ratios, n, lengths, segs)
        out2d = pl.pallas_call(
            kern,
            out_shape=jax.ShapeDtypeStruct((n * lengths[-1], out_lanes),
                                           jnp.float32),
            in_specs=[vmem] * (1 + len(prepared)),
            out_specs=vmem,
            scratch_shapes=scratch,
        )(x2d, *prepared)

        out = out2d.reshape(n, lengths[-1], out_lanes)[:, :, :channels[-1]]
        return jnp.transpose(out, (0, 2, 1))                   # back to NCL

    return jax.jit(forward)


# ---------------------------------------------------------------------------
# Pure-JAX reference for verification (f32 throughout)
# ---------------------------------------------------------------------------

def reference_forward(x, params, channels, kernel, ratios):
    pad = kernel // 2
    for i in range(len(ratios)):
        w = params[f"conv{i}_w"]
        b = params[f"conv{i}_b"]
        x = jax.lax.conv_general_dilated(
            x, w, window_strides=(ratios[i],), padding=[(pad, pad)],
            dimension_numbers=("NCH", "OIH", "NCH"))
        x = x + b[None, :, None]
        if i != len(ratios) - 1:
            x = jnp.where(x >= 0.0, x, 0.01 * x)
            mean = jnp.mean(x, axis=(0, 2), keepdims=True)
            var = jnp.mean((x - mean) ** 2, axis=(0, 2), keepdims=True)
            x = (x - mean) * jax.lax.rsqrt(var + 1e-5)
            x = (x * params[f"bn{i}_g"][None, :, None]
                 + params[f"bn{i}_b"][None, :, None])
    return x


# ---------------------------------------------------------------------------
# Main
# ---------------------------------------------------------------------------

if __name__ == "__main__":
    channels = [4, 8, 16, 32]   # channels[i] -> channels[i+1] per conv layer
    kernel = 5
    ratios = [2, 2, 2]          # strides
    use_cached_padding = False  # plain symmetric-padding path only

    key = jax.random.PRNGKey(0)
    params = {}
    for i in range(len(ratios)):
        key, kw, kb = jax.random.split(key, 3)
        fan_in = channels[i] * kernel
        params[f"conv{i}_w"] = (
            jax.random.normal(kw, (channels[i + 1], channels[i], kernel),
                              jnp.float32) / jnp.sqrt(float(fan_in)))
        params[f"conv{i}_b"] = (
            jax.random.normal(kb, (channels[i + 1],), jnp.float32) * 0.01)
        if i != len(ratios) - 1:
            params[f"bn{i}_g"] = jnp.ones((channels[i + 1],), jnp.float32)
            params[f"bn{i}_b"] = jnp.zeros((channels[i + 1],), jnp.float32)

    key, kx = jax.random.split(key)
    x = jax.random.normal(kx, (2, channels[0], 16), jnp.float32)  # (N, C, L)

    prepared = prepare_params(params, channels, kernel, ratios)
    forward = make_conv_encoder(channels, kernel, ratios)

    out = forward(x, prepared)
    out = jax.block_until_ready(out)

    ref_fn = jax.jit(lambda xx, pp: reference_forward(xx, pp, channels,
                                                      kernel, ratios))
    ref = jax.block_until_ready(ref_fn(x, params))

    assert out.shape == (2, channels[-1], 2), out.shape
    max_err = float(jnp.max(jnp.abs(out - ref)))
    # bf16 MXU operands -> relaxed tolerance vs the f32 reference
    assert jnp.allclose(out, ref, atol=5e-2, rtol=5e-2), max_err

    print("KERNEL_OK")
</pallas_src>

<mosaic_0001>
module attributes {stable_mosaic.version = 11 : i64} {
  func.func @kern(%arg0: memref<64x4xf32, #tpu.memory_space<vmem>>, %arg1: memref<20x8xbf16, #tpu.memory_space<vmem>>, %arg2: memref<1x8xf32, #tpu.memory_space<vmem>>, %arg3: memref<1x8xf32, #tpu.memory_space<vmem>>, %arg4: memref<1x8xf32, #tpu.memory_space<vmem>>, %arg5: memref<40x16xbf16, #tpu.memory_space<vmem>>, %arg6: memref<1x16xf32, #tpu.memory_space<vmem>>, %arg7: memref<1x16xf32, #tpu.memory_space<vmem>>, %arg8: memref<1x16xf32, #tpu.memory_space<vmem>>, %arg9: memref<80x128xbf16, #tpu.memory_space<vmem>>, %arg10: memref<1x128xf32, #tpu.memory_space<vmem>>, %arg11: memref<4x128xf32, #tpu.memory_space<vmem>>, %arg12: memref<48x16xf32, #tpu.memory_space<vmem>>, %arg13: memref<48x16xf32, #tpu.memory_space<vmem>>) attributes {dimension_semantics = [], scalar_prefetch = 0 : i64, scratch_operands = 2 : i64, tpu.core_type = #tpu.core_type<tc>} {
    %c6 = arith.constant 6 : index
    %c0 = arith.constant 0 : index
    %0 = tpu.strided_load %arg0[%c6, %c0] {strides = array<i32: 2, 1>} : memref<64x4xf32, #tpu.memory_space<vmem>>, vector<8x4xf32>
    %c7 = arith.constant 7 : index
    %c0_0 = arith.constant 0 : index
    %1 = tpu.strided_load %arg0[%c7, %c0_0] {strides = array<i32: 2, 1>} : memref<64x4xf32, #tpu.memory_space<vmem>>, vector<8x4xf32>
    %c8 = arith.constant 8 : index
    %c0_1 = arith.constant 0 : index
    %2 = tpu.strided_load %arg0[%c8, %c0_1] {strides = array<i32: 2, 1>} : memref<64x4xf32, #tpu.memory_space<vmem>>, vector<8x4xf32>
    %c9 = arith.constant 9 : index
    %c0_2 = arith.constant 0 : index
    %3 = tpu.strided_load %arg0[%c9, %c0_2] {strides = array<i32: 2, 1>} : memref<64x4xf32, #tpu.memory_space<vmem>>, vector<8x4xf32>
    %c10 = arith.constant 10 : index
    %c0_3 = arith.constant 0 : index
    %4 = tpu.strided_load %arg0[%c10, %c0_3] {strides = array<i32: 2, 1>} : memref<64x4xf32, #tpu.memory_space<vmem>>, vector<8x4xf32>
    %5 = tpu.concatenate %0, %1, %2, %3, %4 in 1 : vector<8x4xf32>, vector<8x4xf32>, vector<8x4xf32>, vector<8x4xf32>, vector<8x4xf32> -> vector<8x20xf32>
    %c38 = arith.constant 38 : index
    %c0_4 = arith.constant 0 : index
    %6 = tpu.strided_load %arg0[%c38, %c0_4] {strides = array<i32: 2, 1>} : memref<64x4xf32, #tpu.memory_space<vmem>>, vector<8x4xf32>
    %c39 = arith.constant 39 : index
    %c0_5 = arith.constant 0 : index
    %7 = tpu.strided_load %arg0[%c39, %c0_5] {strides = array<i32: 2, 1>} : memref<64x4xf32, #tpu.memory_space<vmem>>, vector<8x4xf32>
    %c40 = arith.constant 40 : index
    %c0_6 = arith.constant 0 : index
    %8 = tpu.strided_load %arg0[%c40, %c0_6] {strides = array<i32: 2, 1>} : memref<64x4xf32, #tpu.memory_space<vmem>>, vector<8x4xf32>
    %c41 = arith.constant 41 : index
    %c0_7 = arith.constant 0 : index
    %9 = tpu.strided_load %arg0[%c41, %c0_7] {strides = array<i32: 2, 1>} : memref<64x4xf32, #tpu.memory_space<vmem>>, vector<8x4xf32>
    %c42 = arith.constant 42 : index
    %c0_8 = arith.constant 0 : index
    %10 = tpu.strided_load %arg0[%c42, %c0_8] {strides = array<i32: 2, 1>} : memref<64x4xf32, #tpu.memory_space<vmem>>, vector<8x4xf32>
    %11 = tpu.concatenate %6, %7, %8, %9, %10 in 1 : vector<8x4xf32>, vector<8x4xf32>, vector<8x4xf32>, vector<8x4xf32>, vector<8x4xf32> -> vector<8x20xf32>
    %12 = tpu.concatenate %5, %11 in 0 : vector<8x20xf32>, vector<8x20xf32> -> vector<16x20xf32>
    %13 = arith.truncf %12 : vector<16x20xf32> to vector<16x20xbf16>
    %c0_9 = arith.constant 0 : index
    %c0_10 = arith.constant 0 : index
    %14 = vector.load %arg1[%c0_9, %c0_10] : memref<20x8xbf16, #tpu.memory_space<vmem>>, vector<20x8xbf16>
    %cst = arith.constant dense<0.000000e+00> : vector<16x8xf32>
    %15 = tpu.matmul %13, %14, %cst {dimension_numbers = #tpu.dot_dimension_numbers<[1], [0], [0], [1], [0, 0, 1, 1], [], []>} : vector<16x20xbf16>, vector<20x8xbf16>, vector<16x8xf32> -> vector<16x8xf32>
    %c0_11 = arith.constant 0 : index
    %c0_12 = arith.constant 0 : index
    %16 = vector.load %arg2[%c0_11, %c0_12] : memref<1x8xf32, #tpu.memory_space<vmem>>, vector<1x8xf32>
    %17 = vector.broadcast %16 : vector<1x8xf32> to vector<16x8xf32>
    %18 = arith.addf %15, %17 : vector<16x8xf32>
    %cst_13 = arith.constant 0.000000e+00 : f32
    %19 = vector.broadcast %cst_13 : f32 to vector<16x8xf32>
    %20 = arith.cmpf oge, %18, %19 : vector<16x8xf32>
    %cst_14 = arith.constant 0.00999999977 : f32
    %21 = vector.broadcast %cst_14 : f32 to vector<16x8xf32>
    %22 = arith.mulf %21, %18 : vector<16x8xf32>
    %23 = arith.select %20, %18, %22 : vector<16x8xi1>, vector<16x8xf32>
    %cst_15 = arith.constant dense<0.000000e+00> : vector<8xf32>
    %24 = vector.multi_reduction <add>, %23, %cst_15 [0] : vector<16x8xf32> to vector<8xf32>
    %25 = vector.shape_cast %24 : vector<8xf32> to vector<1x8xf32>
    %26 = arith.mulf %23, %23 : vector<16x8xf32>
    %cst_16 = arith.constant dense<0.000000e+00> : vector<8xf32>
    %27 = vector.multi_reduction <add>, %26, %cst_16 [0] : vector<16x8xf32> to vector<8xf32>
    %28 = vector.shape_cast %27 : vector<8xf32> to vector<1x8xf32>
    %cst_17 = arith.constant 1.600000e+01 : f32
    %29 = vector.broadcast %cst_17 : f32 to vector<1x8xf32>
    %30 = arith.divf %25, %29 : vector<1x8xf32>
    %cst_18 = arith.constant 1.600000e+01 : f32
    %31 = vector.broadcast %cst_18 : f32 to vector<1x8xf32>
    %32 = arith.divf %28, %31 : vector<1x8xf32>
    %33 = arith.mulf %30, %30 : vector<1x8xf32>
    %34 = arith.subf %32, %33 : vector<1x8xf32>
    %cst_19 = arith.constant 0.000000e+00 : f32
    %35 = vector.broadcast %cst_19 : f32 to vector<1x8xf32>
    %36 = arith.maximumf %34, %35 : vector<1x8xf32>
    %cst_20 = arith.constant 9.99999974E-6 : f32
    %37 = vector.broadcast %cst_20 : f32 to vector<1x8xf32>
    %38 = arith.addf %36, %37 : vector<1x8xf32>
    %39 = math.rsqrt %38 : vector<1x8xf32>
    %c0_21 = arith.constant 0 : index
    %c0_22 = arith.constant 0 : index
    %40 = vector.load %arg3[%c0_21, %c0_22] : memref<1x8xf32, #tpu.memory_space<vmem>>, vector<1x8xf32>
    %41 = arith.mulf %39, %40 : vector<1x8xf32>
    %c0_23 = arith.constant 0 : index
    %c0_24 = arith.constant 0 : index
    %42 = vector.load %arg4[%c0_23, %c0_24] : memref<1x8xf32, #tpu.memory_space<vmem>>, vector<1x8xf32>
    %43 = arith.mulf %30, %41 : vector<1x8xf32>
    %44 = arith.subf %42, %43 : vector<1x8xf32>
    %45 = vector.broadcast %41 : vector<1x8xf32> to vector<16x8xf32>
    %46 = arith.mulf %23, %45 : vector<16x8xf32>
    %47 = vector.broadcast %44 : vector<1x8xf32> to vector<16x8xf32>
    %48 = arith.addf %46, %47 : vector<16x8xf32>
    %cst_25 = arith.constant 0.000000e+00 : f32
    %49 = vector.broadcast %cst_25 : f32 to vector<2x8xf32>
    %c6_26 = arith.constant 6 : index
    %c0_27 = arith.constant 0 : index
    %50 = vector.load %arg12[%c6_26, %c0_27] : memref<48x16xf32, #tpu.memory_space<vmem>>, vector<2x8xf32>
    tpu.vector_store %arg12[%c6_26, %c0_27], %49 {strides = array<i32>} : memref<48x16xf32, #tpu.memory_space<vmem>>, vector<2x8xf32>,
    %51 = vector.extract_strided_slice %48 {offsets = [0, 0], sizes = [8, 8], strides = [1, 1]} : vector<16x8xf32> to vector<8x8xf32>
    %c8_28 = arith.constant 8 : index
    %c0_29 = arith.constant 0 : index
    %52 = vector.load %arg12[%c8_28, %c0_29] : memref<48x16xf32, #tpu.memory_space<vmem>>, vector<8x8xf32>
    tpu.vector_store %arg12[%c8_28, %c0_29], %51 {strides = array<i32>} : memref<48x16xf32, #tpu.memory_space<vmem>>, vector<8x8xf32>,
    %c16 = arith.constant 16 : index
    %c0_30 = arith.constant 0 : index
    %53 = vector.load %arg12[%c16, %c0_30] : memref<48x16xf32, #tpu.memory_space<vmem>>, vector<2x8xf32>
    tpu.vector_store %arg12[%c16, %c0_30], %49 {strides = array<i32>} : memref<48x16xf32, #tpu.memory_space<vmem>>, vector<2x8xf32>,
    %c30 = arith.constant 30 : index
    %c0_31 = arith.constant 0 : index
    %54 = vector.load %arg12[%c30, %c0_31] : memref<48x16xf32, #tpu.memory_space<vmem>>, vector<2x8xf32>
    tpu.vector_store %arg12[%c30, %c0_31], %49 {strides = array<i32>} : memref<48x16xf32, #tpu.memory_space<vmem>>, vector<2x8xf32>,
    %55 = vector.extract_strided_slice %48 {offsets = [8, 0], sizes = [8, 8], strides = [1, 1]} : vector<16x8xf32> to vector<8x8xf32>
    %c32 = arith.constant 32 : index
    %c0_32 = arith.constant 0 : index
    %56 = vector.load %arg12[%c32, %c0_32] : memref<48x16xf32, #tpu.memory_space<vmem>>, vector<8x8xf32>
    tpu.vector_store %arg12[%c32, %c0_32], %55 {strides = array<i32>} : memref<48x16xf32, #tpu.memory_space<vmem>>, vector<8x8xf32>,
    %c40_33 = arith.constant 40 : index
    %c0_34 = arith.constant 0 : index
    %57 = vector.load %arg12[%c40_33, %c0_34] : memref<48x16xf32, #tpu.memory_space<vmem>>, vector<2x8xf32>
    tpu.vector_store %arg12[%c40_33, %c0_34], %49 {strides = array<i32>} : memref<48x16xf32, #tpu.memory_space<vmem>>, vector<2x8xf32>,
    %c6_35 = arith.constant 6 : index
    %c0_36 = arith.constant 0 : index
    %58 = tpu.strided_load %arg12[%c6_35, %c0_36] {strides = array<i32: 2, 1>} : memref<48x16xf32, #tpu.memory_space<vmem>>, vector<4x8xf32>
    %c7_37 = arith.constant 7 : index
    %c0_38 = arith.constant 0 : index
    %59 = tpu.strided_load %arg12[%c7_37, %c0_38] {strides = array<i32: 2, 1>} : memref<48x16xf32, #tpu.memory_space<vmem>>, vector<4x8xf32>
    %c8_39 = arith.constant 8 : index
    %c0_40 = arith.constant 0 : index
    %60 = tpu.strided_load %arg12[%c8_39, %c0_40] {strides = array<i32: 2, 1>} : memref<48x16xf32, #tpu.memory_space<vmem>>, vector<4x8xf32>
    %c9_41 = arith.constant 9 : index
    %c0_42 = arith.constant 0 : index
    %61 = tpu.strided_load %arg12[%c9_41, %c0_42] {strides = array<i32: 2, 1>} : memref<48x16xf32, #tpu.memory_space<vmem>>, vector<4x8xf32>
    %c10_43 = arith.constant 10 : index
    %c0_44 = arith.constant 0 : index
    %62 = tpu.strided_load %arg12[%c10_43, %c0_44] {strides = array<i32: 2, 1>} : memref<48x16xf32, #tpu.memory_space<vmem>>, vector<4x8xf32>
    %63 = tpu.concatenate %58, %59, %60, %61, %62 in 1 : vector<4x8xf32>, vector<4x8xf32>, vector<4x8xf32>, vector<4x8xf32>, vector<4x8xf32> -> vector<4x40xf32>
    %c30_45 = arith.constant 30 : index
    %c0_46 = arith.constant 0 : index
    %64 = tpu.strided_load %arg12[%c30_45, %c0_46] {strides = array<i32: 2, 1>} : memref<48x16xf32, #tpu.memory_space<vmem>>, vector<4x8xf32>
    %c31 = arith.constant 31 : index
    %c0_47 = arith.constant 0 : index
    %65 = tpu.strided_load %arg12[%c31, %c0_47] {strides = array<i32: 2, 1>} : memref<48x16xf32, #tpu.memory_space<vmem>>, vector<4x8xf32>
    %c32_48 = arith.constant 32 : index
    %c0_49 = arith.constant 0 : index
    %66 = tpu.strided_load %arg12[%c32_48, %c0_49] {strides = array<i32: 2, 1>} : memref<48x16xf32, #tpu.memory_space<vmem>>, vector<4x8xf32>
    %c33 = arith.constant 33 : index
    %c0_50 = arith.constant 0 : index
    %67 = tpu.strided_load %arg12[%c33, %c0_50] {strides = array<i32: 2, 1>} : memref<48x16xf32, #tpu.memory_space<vmem>>, vector<4x8xf32>
    %c34 = arith.constant 34 : index
    %c0_51 = arith.constant 0 : index
    %68 = tpu.strided_load %arg12[%c34, %c0_51] {strides = array<i32: 2, 1>} : memref<48x16xf32, #tpu.memory_space<vmem>>, vector<4x8xf32>
    %69 = tpu.concatenate %64, %65, %66, %67, %68 in 1 : vector<4x8xf32>, vector<4x8xf32>, vector<4x8xf32>, vector<4x8xf32>, vector<4x8xf32> -> vector<4x40xf32>
    %70 = tpu.concatenate %63, %69 in 0 : vector<4x40xf32>, vector<4x40xf32> -> vector<8x40xf32>
    %71 = arith.truncf %70 : vector<8x40xf32> to vector<8x40xbf16>
    %c0_52 = arith.constant 0 : index
    %c0_53 = arith.constant 0 : index
    %72 = vector.load %arg5[%c0_52, %c0_53] : memref<40x16xbf16, #tpu.memory_space<vmem>>, vector<40x16xbf16>
    %cst_54 = arith.constant dense<0.000000e+00> : vector<8x16xf32>
    %73 = tpu.matmul %71, %72, %cst_54 {dimension_numbers = #tpu.dot_dimension_numbers<[1], [0], [0], [1], [0, 0, 1, 1], [], []>} : vector<8x40xbf16>, vector<40x16xbf16>, vector<8x16xf32> -> vector<8x16xf32>
    %c0_55 = arith.constant 0 : index
    %c0_56 = arith.constant 0 : index
    %74 = vector.load %arg6[%c0_55, %c0_56] : memref<1x16xf32, #tpu.memory_space<vmem>>, vector<1x16xf32>
    %75 = vector.broadcast %74 : vector<1x16xf32> to vector<8x16xf32>
    %76 = arith.addf %73, %75 : vector<8x16xf32>
    %cst_57 = arith.constant 0.000000e+00 : f32
    %77 = vector.broadcast %cst_57 : f32 to vector<8x16xf32>
    %78 = arith.cmpf oge, %76, %77 : vector<8x16xf32>
    %cst_58 = arith.constant 0.00999999977 : f32
    %79 = vector.broadcast %cst_58 : f32 to vector<8x16xf32>
    %80 = arith.mulf %79, %76 : vector<8x16xf32>
    %81 = arith.select %78, %76, %80 : vector<8x16xi1>, vector<8x16xf32>
    %cst_59 = arith.constant dense<0.000000e+00> : vector<16xf32>
    %82 = vector.multi_reduction <add>, %81, %cst_59 [0] : vector<8x16xf32> to vector<16xf32>
    %83 = vector.shape_cast %82 : vector<16xf32> to vector<1x16xf32>
    %84 = arith.mulf %81, %81 : vector<8x16xf32>
    %cst_60 = arith.constant dense<0.000000e+00> : vector<16xf32>
    %85 = vector.multi_reduction <add>, %84, %cst_60 [0] : vector<8x16xf32> to vector<16xf32>
    %86 = vector.shape_cast %85 : vector<16xf32> to vector<1x16xf32>
    %cst_61 = arith.constant 8.000000e+00 : f32
    %87 = vector.broadcast %cst_61 : f32 to vector<1x16xf32>
    %88 = arith.divf %83, %87 : vector<1x16xf32>
    %cst_62 = arith.constant 8.000000e+00 : f32
    %89 = vector.broadcast %cst_62 : f32 to vector<1x16xf32>
    %90 = arith.divf %86, %89 : vector<1x16xf32>
    %91 = arith.mulf %88, %88 : vector<1x16xf32>
    %92 = arith.subf %90, %91 : vector<1x16xf32>
    %cst_63 = arith.constant 0.000000e+00 : f32
    %93 = vector.broadcast %cst_63 : f32 to vector<1x16xf32>
    %94 = arith.maximumf %92, %93 : vector<1x16xf32>
    %cst_64 = arith.constant 9.99999974E-6 : f32
    %95 = vector.broadcast %cst_64 : f32 to vector<1x16xf32>
    %96 = arith.addf %94, %95 : vector<1x16xf32>
    %97 = math.rsqrt %96 : vector<1x16xf32>
    %c0_65 = arith.constant 0 : index
    %c0_66 = arith.constant 0 : index
    %98 = vector.load %arg7[%c0_65, %c0_66] : memref<1x16xf32, #tpu.memory_space<vmem>>, vector<1x16xf32>
    %99 = arith.mulf %97, %98 : vector<1x16xf32>
    %c0_67 = arith.constant 0 : index
    %c0_68 = arith.constant 0 : index
    %100 = vector.load %arg8[%c0_67, %c0_68] : memref<1x16xf32, #tpu.memory_space<vmem>>, vector<1x16xf32>
    %101 = arith.mulf %88, %99 : vector<1x16xf32>
    %102 = arith.subf %100, %101 : vector<1x16xf32>
    %103 = vector.broadcast %99 : vector<1x16xf32> to vector<8x16xf32>
    %104 = arith.mulf %81, %103 : vector<8x16xf32>
    %105 = vector.broadcast %102 : vector<1x16xf32> to vector<8x16xf32>
    %106 = arith.addf %104, %105 : vector<8x16xf32>
    %cst_69 = arith.constant 0.000000e+00 : f32
    %107 = vector.broadcast %cst_69 : f32 to vector<2x16xf32>
    %c6_70 = arith.constant 6 : index
    %c0_71 = arith.constant 0 : index
    %108 = vector.load %arg13[%c6_70, %c0_71] : memref<48x16xf32, #tpu.memory_space<vmem>>, vector<2x16xf32>
    tpu.vector_store %arg13[%c6_70, %c0_71], %107 {strides = array<i32>} : memref<48x16xf32, #tpu.memory_space<vmem>>, vector<2x16xf32>,
    %109 = vector.extract_strided_slice %106 {offsets = [0, 0], sizes = [4, 16], strides = [1, 1]} : vector<8x16xf32> to vector<4x16xf32>
    %c8_72 = arith.constant 8 : index
    %c0_73 = arith.constant 0 : index
    %110 = vector.load %arg13[%c8_72, %c0_73] : memref<48x16xf32, #tpu.memory_space<vmem>>, vector<4x16xf32>
    tpu.vector_store %arg13[%c8_72, %c0_73], %109 {strides = array<i32>} : memref<48x16xf32, #tpu.memory_space<vmem>>, vector<4x16xf32>,
    %c12 = arith.constant 12 : index
    %c0_74 = arith.constant 0 : index
    %111 = vector.load %arg13[%c12, %c0_74] : memref<48x16xf32, #tpu.memory_space<vmem>>, vector<2x16xf32>
    tpu.vector_store %arg13[%c12, %c0_74], %107 {strides = array<i32>} : memref<48x16xf32, #tpu.memory_space<vmem>>, vector<2x16xf32>,
    %c22 = arith.constant 22 : index
    %c0_75 = arith.constant 0 : index
    %112 = vector.load %arg13[%c22, %c0_75] : memref<48x16xf32, #tpu.memory_space<vmem>>, vector<2x16xf32>
    tpu.vector_store %arg13[%c22, %c0_75], %107 {strides = array<i32>} : memref<48x16xf32, #tpu.memory_space<vmem>>, vector<2x16xf32>,
    %113 = vector.extract_strided_slice %106 {offsets = [4, 0], sizes = [4, 16], strides = [1, 1]} : vector<8x16xf32> to vector<4x16xf32>
    %c24 = arith.constant 24 : index
    %c0_76 = arith.constant 0 : index
    %114 = vector.load %arg13[%c24, %c0_76] : memref<48x16xf32, #tpu.memory_space<vmem>>, vector<4x16xf32>
    tpu.vector_store %arg13[%c24, %c0_76], %113 {strides = array<i32>} : memref<48x16xf32, #tpu.memory_space<vmem>>, vector<4x16xf32>,
    %c28 = arith.constant 28 : index
    %c0_77 = arith.constant 0 : index
    %115 = vector.load %arg13[%c28, %c0_77] : memref<48x16xf32, #tpu.memory_space<vmem>>, vector<2x16xf32>
    tpu.vector_store %arg13[%c28, %c0_77], %107 {strides = array<i32>} : memref<48x16xf32, #tpu.memory_space<vmem>>, vector<2x16xf32>,
    %c6_78 = arith.constant 6 : index
    %c0_79 = arith.constant 0 : index
    %116 = tpu.strided_load %arg13[%c6_78, %c0_79] {strides = array<i32: 2, 1>} : memref<48x16xf32, #tpu.memory_space<vmem>>, vector<2x16xf32>
    %c7_80 = arith.constant 7 : index
    %c0_81 = arith.constant 0 : index
    %117 = tpu.strided_load %arg13[%c7_80, %c0_81] {strides = array<i32: 2, 1>} : memref<48x16xf32, #tpu.memory_space<vmem>>, vector<2x16xf32>
    %c8_82 = arith.constant 8 : index
    %c0_83 = arith.constant 0 : index
    %118 = tpu.strided_load %arg13[%c8_82, %c0_83] {strides = array<i32: 2, 1>} : memref<48x16xf32, #tpu.memory_space<vmem>>, vector<2x16xf32>
    %c9_84 = arith.constant 9 : index
    %c0_85 = arith.constant 0 : index
    %119 = tpu.strided_load %arg13[%c9_84, %c0_85] {strides = array<i32: 2, 1>} : memref<48x16xf32, #tpu.memory_space<vmem>>, vector<2x16xf32>
    %c10_86 = arith.constant 10 : index
    %c0_87 = arith.constant 0 : index
    %120 = tpu.strided_load %arg13[%c10_86, %c0_87] {strides = array<i32: 2, 1>} : memref<48x16xf32, #tpu.memory_space<vmem>>, vector<2x16xf32>
    %121 = tpu.concatenate %116, %117, %118, %119, %120 in 1 : vector<2x16xf32>, vector<2x16xf32>, vector<2x16xf32>, vector<2x16xf32>, vector<2x16xf32> -> vector<2x80xf32>
    %c22_88 = arith.constant 22 : index
    %c0_89 = arith.constant 0 : index
    %122 = tpu.strided_load %arg13[%c22_88, %c0_89] {strides = array<i32: 2, 1>} : memref<48x16xf32, #tpu.memory_space<vmem>>, vector<2x16xf32>
    %c23 = arith.constant 23 : index
    %c0_90 = arith.constant 0 : index
    %123 = tpu.strided_load %arg13[%c23, %c0_90] {strides = array<i32: 2, 1>} : memref<48x16xf32, #tpu.memory_space<vmem>>, vector<2x16xf32>
    %c24_91 = arith.constant 24 : index
    %c0_92 = arith.constant 0 : index
    %124 = tpu.strided_load %arg13[%c24_91, %c0_92] {strides = array<i32: 2, 1>} : memref<48x16xf32, #tpu.memory_space<vmem>>, vector<2x16xf32>
    %c25 = arith.constant 25 : index
    %c0_93 = arith.constant 0 : index
    %125 = tpu.strided_load %arg13[%c25, %c0_93] {strides = array<i32: 2, 1>} : memref<48x16xf32, #tpu.memory_space<vmem>>, vector<2x16xf32>
    %c26 = arith.constant 26 : index
    %c0_94 = arith.constant 0 : index
    %126 = tpu.strided_load %arg13[%c26, %c0_94] {strides = array<i32: 2, 1>} : memref<48x16xf32, #tpu.memory_space<vmem>>, vector<2x16xf32>
    %127 = tpu.concatenate %122, %123, %124, %125, %126 in 1 : vector<2x16xf32>, vector<2x16xf32>, vector<2x16xf32>, vector<2x16xf32>, vector<2x16xf32> -> vector<2x80xf32>
    %128 = tpu.concatenate %121, %127 in 0 : vector<2x80xf32>, vector<2x80xf32> -> vector<4x80xf32>
    %129 = arith.truncf %128 : vector<4x80xf32> to vector<4x80xbf16>
    %c0_95 = arith.constant 0 : index
    %c0_96 = arith.constant 0 : index
    %130 = vector.load %arg9[%c0_95, %c0_96] : memref<80x128xbf16, #tpu.memory_space<vmem>>, vector<80x128xbf16>
    %cst_97 = arith.constant dense<0.000000e+00> : vector<4x128xf32>
    %131 = tpu.matmul %129, %130, %cst_97 {dimension_numbers = #tpu.dot_dimension_numbers<[1], [0], [0], [1], [0, 0, 1, 1], [], []>} : vector<4x80xbf16>, vector<80x128xbf16>, vector<4x128xf32> -> vector<4x128xf32>
    %c0_98 = arith.constant 0 : index
    %c0_99 = arith.constant 0 : index
    %132 = vector.load %arg10[%c0_98, %c0_99] : memref<1x128xf32, #tpu.memory_space<vmem>>, vector<1x128xf32>
    %133 = vector.broadcast %132 : vector<1x128xf32> to vector<4x128xf32>
    %134 = arith.addf %131, %133 : vector<4x128xf32>
    %c0_100 = arith.constant 0 : index
    %c0_101 = arith.constant 0 : index
    %135 = vector.load %arg11[%c0_100, %c0_101] : memref<4x128xf32, #tpu.memory_space<vmem>>, vector<4x128xf32>
    tpu.vector_store %arg11[%c0_100, %c0_101], %134 {strides = array<i32>} : memref<4x128xf32, #tpu.memory_space<vmem>>, vector<4x128xf32>,
    return
  }
}

</mosaic_0001>

<bundles_post_ra>
// kernel: forward.1
= control target key start
LH: loop header
LB: loop body
LE: loop exit
PB: predicated region body
PF: predicated region fallthrough
CT: control target
= control target key end

     0   :  { %v734_v3 = vmov 0.0   ;;  %s735_s14 = smov 4   ;;  %s736_s15 = smov 12   ;;  %vm127_vm0 = vcmask 1041408   ;;  %vm737_vm1 = vmmov 0   ;;  %vm65_vm2 = vcmask 31744   ;;  %s952_s0 = inlined_call_operand.vmem [shape: f32[64,4], index: 0, kind: input, shape index: {}]   ;;  %s953_s1 = inlined_call_operand.vmem [shape: bf16[20,8], index: 1, kind: input, shape index: {}]   ;;  %s954_s2 = inlined_call_operand.vmem [shape: f32[1,8], index: 2, kind: input, shape index: {}]   ;;  %s955_s3 = inlined_call_operand.vmem [shape: f32[1,8], index: 3, kind: input, shape index: {}]   ;;  %s956_s4 = inlined_call_operand.vmem [shape: f32[1,8], index: 4, kind: input, shape index: {}]   ;;  %s957_s5 = inlined_call_operand.vmem [shape: bf16[40,16], index: 5, kind: input, shape index: {}]   ;;  %s958_s9 = inlined_call_operand.vmem [shape: bf16[80,128], index: 9, kind: input, shape index: {}]   ;;  %s959_s6 = inlined_call_operand.vmem [shape: f32[1,16], index: 6, kind: input, shape index: {}]   ;;  %s960_s7 = inlined_call_operand.vmem [shape: f32[1,16], index: 7, kind: input, shape index: {}]   ;;  %s961_s8 = inlined_call_operand.vmem [shape: f32[1,16], index: 8, kind: input, shape index: {}]   ;;  %s962_s10 = inlined_call_operand.vmem [shape: f32[1,128], index: 10, kind: input, shape index: {}]   ;;  %s963_s11 = inlined_call_operand.vmem [shape: f32[4,128], index: 11, kind: output, shape index: {}]  }
   0x1   :  { %v590_v0 = vld [vmem:[%s952_s0 + $0x7] ss:$2 sm:$0xff]  ;;  %628 = vmatprep.subr.bf16.mxu1 %v734_v3  ;;  %646 = vmatprep.subr.bf16.mxu0 %v734_v3  ;;  %v591_v6 = vld [vmem:[%s952_s0 + $0x8] ss:$2 sm:$0xff]  ;;  %s738_s20 = smov 8   ;;  %s739_s21 = smov 16  }
   0x2   :  { %v595_v1 = vld [vmem:[%s952_s0 + $0x27] ss:$2 sm:$0xff]  ;;  %v596_v8 = vld [vmem:[%s952_s0 + $0x28] ss:$2 sm:$0xff]  ;;  %632 = vmatprep.mubr.msk.bf16.mxu1 %vm737_vm1, %v734_v3  ;;  %656 = vmatprep.mubr.msk.bf16.mxu0 %vm737_vm1, %v734_v3  ;;  %vm67_vm3 = vcmask 64512   ;;  %vm69_vm4 = vcmask 97280  }
   0x3   :  { %v592_v2 = vld [vmem:[%s952_s0 + $0x9] ss:$2 sm:$0xff]  ;;  %v670_v4 = vpack.i.bf16 %v595_v1, %v590_v0  ;;  %v593_v9 = vld [vmem:[%s952_s0 + $0xa] ss:$2 sm:$0xff]  ;;  %v675_v11 = vpack.i.bf16 %v596_v8, %v591_v6  ;;  %v720_v13 = vld [vmem:[%s953_s1] sm:$0xff]   ;;  %vm71_vm5 = vcmask 130048  }
   0x4   :  { %v597_v5 = vld [vmem:[%s952_s0 + $0x29] ss:$2 sm:$0xff]  ;;  %v598_v10 = vld [vmem:[%s952_s0 + $0x2a] ss:$2 sm:$0xff]  ;;  %629 = vmatpush3.bf16.msra.mxu1 %v720_v13  ;;  %vm123_vm6 = vcmask 162816   ;;  %vm225_vm7 = vcmask 58368   ;;  %v211_v13 = vlaneseq }
   0x5   :  { %v680_v7 = vpack.i.bf16 %v597_v5, %v592_v2  ;;  %671 = vrot.lane.b32.xlu0 %v670_v4, %s735_s14  ;;  %v685_v12 = vpack.i.bf16 %v598_v10, %v593_v9  ;;  %v721_v14 = vld [vmem:[%s953_s1 + $0x8] ss:$0 sps:$4 sm:$0x33]   ;;  %630 = vmatprep.subr.bf16.mxu1 %v734_v3  ;;  %226 = vst.msk [vmem:[#allocation2 + $0x6] sm:$0x3] %vm225_vm7, %v734_v3  ;;  %vm297_vm10 = vcmask 1043456  }
   0x6   :  { %v129_v15 = vsel %vm127_vm0, %v721_v14, 0  ;;  %v594_v20 = vld [vmem:[%s952_s0 + $0x26] ss:$2 sm:$0xff]  ;;  %229 = vst.msk [vmem:[#allocation2 + $0x1e] sm:$0x3] %vm225_vm7, %v734_v3  ;;  %v212_v14 = vshrl.u32 %v211_v13, 7 }
   0x7   :  { %681 = vrot.lane.b32.xlu1 %v680_v7, %s736_s15  ;;  %v589_v21 = vld [vmem:[%s952_s0 + $0x6] ss:$2 sm:$0xff]  ;;  %228 = vst.msk [vmem:[#allocation2 + $0x10] sm:$0x3] %vm225_vm7, %v734_v3  ;;  %231 = vst.msk [vmem:[#allocation2 + $0x28] sm:$0x3] %vm225_vm7, %v734_v3 }
   0x8   :  { %631 = vmatpush3.bf16.msra.mxu1 %v129_v15  ;;  %v599_v39 = vld [vmem:[%s954_s2] ss:$0 sm:$0xff]  ;;  %s740_s14 = smov 32   ;;  %s741_s15 = smov 24   ;;  %vm260_vm11 = vcmask 195584   ;;  %vm262_vm12 = vcmask 261120  }
   0x9   :  { %676 = vrot.lane.b32.xlu0 %v675_v11, %s738_s20  ;;  %636 = vmatprep.subr.bf16.mxu1 %v734_v3  ;;  %v206_v15 = vld [vmem:[%s955_s3] sm:$0x1]  ;;  %vm327_vm13 = vcmask 326656   ;;  %vm417_vm14 = vcmask 123904   ;;  %s742_s26 = smov 64   ;;  %s743_s27 = smov 48  }
   0xa   :  { %418 = vst.msk [vmem:[#allocation3 + $0x6] sm:$0x3] %vm417_vm14, %v734_v3  ;;  %422 = vst.msk [vmem:[#allocation3 + $0x16] sm:$0x3] %vm417_vm14, %v734_v3 }
   0xb   :  { %686 = vrot.lane.b32.xlu1 %v685_v12, %s739_s21  ;;  %421 = vst.msk [vmem:[#allocation3 + $0xc] sm:$0x3] %vm417_vm14, %v734_v3  ;;  %425 = vst.msk [vmem:[#allocation3 + $0x1c] sm:$0x3] %vm417_vm14, %v734_v3 }
  0x77   :  { %v672_v16 = vpop.permute.xlu0 %671 }
  0x78   :  { %v674_v18 = vunpack.i.h.bf16 %v672_v16  ;;  %v673_v19 = vunpack.i.l.bf16 %v672_v16  ;;  %v871_v16 = vsub.s32 0, %v212_v14 }
  0x79   :  { %v682_v17 = vpop.permute.xlu1 %681 }
  0x7a   :  { %v684_v23 = vunpack.i.h.bf16 %v682_v17  ;;  %v683_v24 = vunpack.i.l.bf16 %v682_v17  ;;  %v99_v28 = vsel %vm65_vm2, %v594_v20, %v674_v18  ;;  %v66_v29 = vsel %vm65_vm2, %v589_v21, %v673_v19  ;;  %v208_v19 = vld [vmem:[%s956_s4] sm:$0x1] }
  0x7b   :  { %v677_v22 = vpop.permute.xlu0 %676  ;;  %vm423_vm2 = vcmask 130052  }
  0x7c   :  { %v679_v25 = vunpack.i.h.bf16 %v677_v22  ;;  %v678_v26 = vunpack.i.l.bf16 %v677_v22 }
  0x7d   :  { %v687_v27 = vpop.permute.xlu1 %686 }
  0x7e   :  { %v689_v30 = vunpack.i.h.bf16 %v687_v27  ;;  %v688_v31 = vunpack.i.l.bf16 %v687_v27  ;;  %v68_v32 = vsel %vm67_vm3, %v66_v29, %v678_v26  ;;  %v100_v33 = vsel %vm67_vm3, %v99_v28, %v679_v25  ;;  %v722_v28 = vld [vmem:[%s957_s5] sm:$0xff]   ;;  %v723_v29 = vld [vmem:[%s957_s5 + $0x8] sm:$0xff]  }
  0x7f   :  { %v70_v34 = vsel %vm69_vm4, %v68_v32, %v683_v24  ;;  %v101_v35 = vsel %vm69_vm4, %v100_v33, %v684_v23  ;;  %vm456_vm4 = vcmask 523264  }
  0x80   :  { %v72_v36 = vsel %vm71_vm5, %v70_v34, %v688_v31  ;;  %v102_v37 = vsel %vm71_vm5, %v101_v35, %v689_v30 }
  0x81   :  { %v103_v38 = vpack.c.bf16 %v102_v37, %v72_v36 }
  0x83   :  { %633 = vmatmul.mubr.msk.bf16.vlgmr.msra.gmra.mrb[0].mxu1 %vm123_vm6, %v103_v38  ;;  %v724_v38 = vld [vmem:[%s957_s5 + $0x10] ss:$0 sps:$4 sm:$0xff]   ;;  %vm540_vm6 = vcmask 654336  }
  0x84   :  { %642 = vmatprep.mubr.msk.bf16.mxu1 %vm737_vm1, %v734_v3  ;;  %637 = vmatpush3.bf16.msra.mxu1 %v722_v28  ;;  %vm419_vm1 = vcmask 125952  }
  0x85   :  { %638 = vmatprep.subr.bf16.mxu1 %v734_v3 }
  0x88   :  { %639 = vmatpush3.bf16.msra.mxu1 %v723_v29 }
  0x89   :  { %640 = vmatprep.subr.bf16.mxu1 %v734_v3 }
 0x156   :  { %v165_v40 = vpop.f32.mrb[0].mxu1 }
 0x157   :  { %v166_v41 = vadd.f32 %v599_v39, %v165_v40  ;;  %v634_v42 = vpop.f32.mrb[1].mxu1 }
 0x158   :  { %v168_v43 = vpop.f32.mrb[2].mxu1 }
 0x159   :  { %vm172_vm8 = vcmp.ge.f32.partialorder %v166_v41, 0.0  ;;  %v174_v44 = vmul.f32 0.01, %v166_v41  ;;  %v169_v45 = vadd.f32 %v599_v39, %v168_v43  ;;  %v635_v46 = vpop.f32.mrb[3].mxu1 }
 0x15b   :  { %v176_v47 = vsel %vm172_vm8, %v166_v41, %v174_v44  ;;  %vm173_vm9 = vcmp.ge.f32.partialorder %v169_v45, 0.0  ;;  %v175_v48 = vmul.f32 0.01, %v169_v45  ;;  %v332_v41 = vsel %vm297_vm10, %v724_v38, 0 }
 0x15c   :  { %v187_v49 = vmul.f32 %v176_v47, %v176_v47  ;;  %v178_v51 = vsel %vm67_vm3, %v176_v47, 0.0  ;;  %641 = vmatpush3.bf16.msra.mxu1 %v332_v41 }
 0x15d   :  { %v177_v50 = vsel %vm173_vm9, %v169_v45, %v175_v48 }
 0x15e   :  { %v179_v52 = vsel %vm67_vm3, %v177_v50, 0.0  ;;  %v188_v53 = vmul.f32 %v177_v50, %v177_v50  ;;  %v189_v55 = vsel %vm67_vm3, %v187_v49, 0.0 }
 0x15f   :  { %v180_v54 = vadd.f32 %v179_v52, %v178_v51 }
 0x160   :  { %v190_v56 = vsel %vm67_vm3, %v188_v53, 0.0 }
 0x161   :  { %v181_v57 = vrot.slane %v180_v54, 4  ;;  %v191_v58 = vadd.f32 %v190_v56, %v189_v55 }
 0x163   :  { %v182_v59 = vadd.f32 %v181_v57, %v180_v54  ;;  %v192_v60 = vrot.slane %v191_v58, 4 }
 0x165   :  { %v183_v61 = vrot.slane %v182_v59, 2  ;;  %v193_v62 = vadd.f32 %v192_v60, %v191_v58 }
 0x167   :  { %v184_v63 = vadd.f32 %v183_v61, %v182_v59  ;;  %v194_v0 = vrot.slane %v193_v62, 2 }
 0x169   :  { %v185_v1 = vrot.slane %v184_v63, 1  ;;  %v195_v2 = vadd.f32 %v194_v0, %v193_v62 }
 0x16b   :  { %v186_v4 = vadd.f32 %v185_v1, %v184_v63  ;;  %v196_v5 = vrot.slane %v195_v2, 1 }
 0x16d   :  { %v197_v6 = vadd.f32 %v196_v5, %v195_v2  ;;  %v199_v7 = vmul.f32 0.0625, %v186_v4  ;;  %v725_v4 = vld [vmem:[%s958_s9] sm:$0xff]   ;;  %v726_v5 = vld [vmem:[%s958_s9 + $0x8] sm:$0xff]  }
 0x16e   :  { %647 = vmatpush3.bf16.msra.mxu0 %v725_v4 }
 0x16f   :  { %v200_v8 = vmul.f32 0.0625, %v197_v6  ;;  %v201_v9 = vmul.f32 %v199_v7, %v199_v7  ;;  %648 = vmatprep.subr.bf16.mxu0 %v734_v3  ;;  %v603_v6 = vld [vmem:[%s959_s6] ss:$0 sm:$0xff] }
 0x171   :  { %v202_v10 = vsub.f32 %v200_v8, %v201_v9 }
 0x172   :  { %649 = vmatpush3.bf16.msra.mxu0 %v726_v5 }
 0x173   :  { %v203_v11 = vmax.f32 %v202_v10, 0.0  ;;  %650 = vmatprep.subr.bf16.mxu0 %v734_v3 }
 0x175   :  { %v204_v12 = vadd.f32 1e-05, %v203_v11 }
 0x177   :  { %730 = vrsqrt.f32 %v204_v12 }
 0x181   :  { %v731_v17 = vpop.eup %730 }
 0x182   :  { %v207_v18 = vmul.f32 %v731_v17, %v206_v15 }
 0x184   :  { %v209_v20 = vmul.f32 %v207_v18, %v199_v7  ;;  %v214_v21 = vrot.slane %v207_v18, %v871_v16 }
 0x186   :  { %v210_v22 = vsub.f32 %v208_v19, %v209_v20  ;;  %v215_v23 = vmul.f32 %v214_v21, %v176_v47  ;;  %v216_v24 = vmul.f32 %v214_v21, %v177_v50 }
 0x188   :  { %v221_v25 = vrot.slane %v210_v22, %v871_v16 }
 0x18a   :  { %v223_v26 = vadd.f32 %v221_v25, %v215_v23  ;;  %v224_v27 = vadd.f32 %v221_v25, %v216_v24 }
 0x18c   :  { %227 = vst.msk [vmem:[#allocation2 + $0x8] sm:$0xff] %vm67_vm3, %v223_v26  ;;  %230 = vst.msk [vmem:[#allocation2 + $0x20] sm:$0xff] %vm67_vm3, %v224_v27 }
 0x193   :  { %v237_v30 = vld [vmem:[#allocation2 + $0x8] ss:$2 sm:$0xf]  ;;  %v269_v31 = vld [vmem:[#allocation2 + $0x20] ss:$2 sm:$0xf] }
 0x194   :  { %v695_v32 = vpack.i.bf16 %v237_v30, %v269_v31  ;;  %v235_v33 = vld [vmem:[#allocation2 + $0x7] ss:$2 sm:$0xf]  ;;  %v267_v34 = vld [vmem:[#allocation2 + $0x1f] ss:$2 sm:$0xf] }
 0x195   :  { %v690_v35 = vpack.i.bf16 %v235_v33, %v267_v34  ;;  %v239_v36 = vld [vmem:[#allocation2 + $0x9] ss:$2 sm:$0xf]  ;;  %v271_v37 = vld [vmem:[#allocation2 + $0x21] ss:$2 sm:$0xf] }
 0x196   :  { %696 = vrot.lane.b32.xlu1 %v695_v32, %s739_s21  ;;  %v273_v39 = vld [vmem:[#allocation2 + $0x22] ss:$2 sm:$0xf]  ;;  %v700_v40 = vpack.i.bf16 %v239_v36, %v271_v37  ;;  %v241_v42 = vld [vmem:[#allocation2 + $0xa] ss:$2 sm:$0xf] }
 0x197   :  { %691 = vrot.lane.b32.xlu0 %v690_v35, %s738_s20  ;;  %v265_v49 = vld [vmem:[#allocation2 + $0x1e] ss:$2 sm:$0xf]  ;;  %v233_v50 = vld [vmem:[#allocation2 + $0x6] ss:$2 sm:$0xf] }
 0x198   :  { %v400_v36 = vld [vmem:[%s960_s7] sm:$0x1] }
 0x19a   :  { %287 = vrot.lane.b32.xlu1 %v273_v39, %s740_s14  ;;  %v402_v39 = vld [vmem:[%s961_s8] sm:$0x1] }
 0x19b   :  { %701 = vrot.lane.b32.xlu0 %v700_v40, %s741_s15 }
 0x19f   :  { %255 = vrot.lane.b32.xlu0 %v241_v42, %s740_s14 }
 0x208   :  { %v697_v43 = vpop.permute.xlu1 %696 }
 0x209   :  { %v692_v44 = vpop.permute.xlu0 %691  ;;  %v699_v47 = vunpack.i.h.bf16 %v697_v43  ;;  %v698_v48 = vunpack.i.l.bf16 %v697_v43 }
 0x20a   :  { %v694_v45 = vunpack.i.h.bf16 %v692_v44  ;;  %v693_v46 = vunpack.i.l.bf16 %v692_v44 }
 0x20c   :  { %v258_v51 = vsel %vm67_vm3, %v233_v50, %v694_v45  ;;  %v290_v52 = vsel %vm67_vm3, %v265_v49, %v693_v46  ;;  %v288_v58 = vpop.permute.xlu1 %287  ;;  %v727_v46 = vld [vmem:[%s958_s9 + $0x10] sm:$0xff]   ;;  %vm454_vm3 = vcmask 392192  }
 0x20d   :  { %v702_v53 = vpop.permute.xlu0 %701  ;;  %v291_v56 = vsel %vm71_vm5, %v290_v52, %v698_v48  ;;  %v259_v57 = vsel %vm71_vm5, %v258_v51, %v699_v47  ;;  %651 = vmatpush3.bf16.msra.mxu0 %v727_v46  ;;  %v728_v47 = vld [vmem:[%s958_s9 + $0x18] sm:$0xff]  }
 0x20e   :  { %v704_v54 = vunpack.i.h.bf16 %v702_v53  ;;  %v703_v55 = vunpack.i.l.bf16 %v702_v53  ;;  %652 = vmatprep.subr.bf16.mxu0 %v734_v3 }
 0x210   :  { %v292_v59 = vsel %vm260_vm11, %v291_v56, %v703_v55  ;;  %v261_v60 = vsel %vm260_vm11, %v259_v57, %v704_v54  ;;  %v729_v55 = vld [vmem:[%s958_s9 + $0x20] sm:$0xff]  }
 0x211   :  { %v256_v61 = vpop.permute.xlu0 %255  ;;  %v293_v62 = vsel %vm262_vm12, %v292_v59, %v288_v58  ;;  %653 = vmatpush3.bf16.msra.mxu0 %v728_v47 }
 0x212   :  { %v263_v63 = vsel %vm262_vm12, %v261_v60, %v256_v61  ;;  %v295_v0 = vrot.slane %v293_v62, 4  ;;  %654 = vmatprep.subr.bf16.mxu0 %v734_v3 }
 0x214   :  { %v298_v1 = vsel %vm297_vm10, %v263_v63, %v295_v0 }
 0x215   :  { %v299_v2 = vpack.c.bf16 %v298_v1, %v298_v1  ;;  %655 = vmatpush3.bf16.msra.mxu0 %v729_v55 }
 0x217   :  { %643 = vmatmul.mubr.msk.bf16.vlgmr.msra.gmra.mrb[4].mxu1 %vm327_vm13, %v299_v2 }
 0x2ea   :  { %v368_v7 = vpop.f32.mrb[4].mxu1 }
 0x2eb   :  { %v369_v8 = vadd.f32 %v603_v6, %v368_v7  ;;  %v644_v9 = vpop.f32.mrb[5].mxu1 }
 0x2ec   :  { %v371_v10 = vpop.f32.mrb[6].mxu1 }
 0x2ed   :  { %vm374_vm15 = vcmp.ge.f32.partialorder %v369_v8, 0.0  ;;  %v375_v11 = vmul.f32 0.01, %v369_v8  ;;  %v645_v12 = vpop.f32.mrb[7].mxu1 }
 0x2ef   :  { %v376_v13 = vsel %vm374_vm15, %v369_v8, %v375_v11 }
 0x2f0   :  { %v377_v14 = vsel %vm71_vm5, %v376_v13, 0.0  ;;  %v384_v15 = vmul.f32 %v376_v13, %v376_v13 }
 0x2f1   :  { %v378_v17 = vrot.slane %v377_v14, 4 }
 0x2f2   :  { %v385_v18 = vsel %vm71_vm5, %v384_v15, 0.0 }
 0x2f3   :  { %v379_v19 = vadd.f32 %v378_v17, %v377_v14  ;;  %v386_v20 = vrot.slane %v385_v18, 4 }
 0x2f5   :  { %v380_v21 = vrot.slane %v379_v19, 2  ;;  %v387_v22 = vadd.f32 %v386_v20, %v385_v18  ;;  %v608_v20 = vld [vmem:[%s962_s10] ss:$0 sm:$0xff] }
 0x2f7   :  { %v381_v23 = vadd.f32 %v380_v21, %v379_v19  ;;  %v388_v24 = vrot.slane %v387_v22, 2 }
 0x2f9   :  { %v382_v25 = vrot.slane %v381_v23, 1  ;;  %v389_v26 = vadd.f32 %v388_v24, %v387_v22 }
 0x2fb   :  { %v383_v27 = vadd.f32 %v382_v25, %v381_v23  ;;  %v390_v28 = vrot.slane %v389_v26, 1 }
 0x2fd   :  { %v391_v29 = vadd.f32 %v390_v28, %v389_v26  ;;  %v393_v30 = vmul.f32 0.125, %v383_v27 }
 0x2ff   :  { %v394_v31 = vmul.f32 0.125, %v391_v29  ;;  %v395_v32 = vmul.f32 %v393_v30, %v393_v30 }
 0x301   :  { %v396_v33 = vsub.f32 %v394_v31, %v395_v32 }
 0x303   :  { %v397_v34 = vmax.f32 %v396_v33, 0.0 }
 0x305   :  { %v398_v35 = vadd.f32 1e-05, %v397_v34 }
 0x307   :  { %732 = vrsqrt.f32 %v398_v35 }
 0x311   :  { %v733_v37 = vpop.eup %732 }
 0x312   :  { %v401_v38 = vmul.f32 %v733_v37, %v400_v36 }
 0x314   :  { %v403_v40 = vmul.f32 %v401_v38, %v393_v30  ;;  %v408_v41 = vrot.slane %v401_v38, %v871_v16 }
 0x316   :  { %v404_v42 = vsub.f32 %v402_v39, %v403_v40  ;;  %v409_v43 = vmul.f32 %v408_v41, %v376_v13 }
 0x318   :  { %v414_v44 = vrot.slane %v404_v42, %v871_v16 }
 0x31a   :  { %v416_v45 = vadd.f32 %v414_v44, %v409_v43 }
 0x31c   :  { %420 = vst.msk [vmem:[#allocation3 + $0x8] sm:$0xf] %vm419_vm1, %v416_v45 }
 0x31d   :  { %424 = vst.msk [vmem:[#allocation3 + $0x14] sm:$0xf0] %vm423_vm2, %v416_v45 }
 0x323   :  { %v431_v48 = vld [vmem:[#allocation3 + $0x8] ss:$2 sm:$0x3]  ;;  %v429_v50 = vld [vmem:[#allocation3 + $0x7] ss:$2 sm:$0x3] }
 0x324   :  { %v463_v49 = vld [vmem:[#allocation3 + $0x18] ss:$2 sm:$0x3]  ;;  %v461_v51 = vld [vmem:[#allocation3 + $0x17] ss:$2 sm:$0x3] }
 0x325   :  { %v710_v16 = vpack.i.bf16 %v431_v48, %v463_v49  ;;  %v705_v52 = vpack.i.bf16 %v429_v50, %v461_v51  ;;  %v433_v53 = vld [vmem:[#allocation3 + $0x9] ss:$2 sm:$0x3]  ;;  %v465_v54 = vld [vmem:[#allocation3 + $0x19] ss:$2 sm:$0x3] }
 0x326   :  { %v467_v56 = vld [vmem:[#allocation3 + $0x1a] ss:$2 sm:$0x3]  ;;  %v715_v57 = vpack.i.bf16 %v433_v53, %v465_v54  ;;  %v435_v3 = vld [vmem:[#allocation3 + $0xa] ss:$2 sm:$0x3] }
 0x327   :  { %711 = vrot.lane.b32.xlu0 %v710_v16, %s740_s14  ;;  %706 = vrot.lane.b32.xlu1 %v705_v52, %s739_s21  ;;  %v459_v0 = vld [vmem:[#allocation3 + $0x16] ss:$2 sm:$0x3]  ;;  %v427_v1 = vld [vmem:[#allocation3 + $0x6] ss:$2 sm:$0x3] }
 0x32b   :  { %481 = vrot.lane.b32.xlu0 %v467_v56, %s742_s26  ;;  %716 = vrot.lane.b32.xlu1 %v715_v57, %s743_s27 }
 0x32f   :  { %449 = vrot.lane.b32.xlu1 %v435_v3, %s742_s26 }
 0x399   :  { %v712_v58 = vpop.permute.xlu0 %711  ;;  %v707_v59 = vpop.permute.xlu1 %706 }
 0x39a   :  { %v709_v60 = vunpack.i.h.bf16 %v707_v59  ;;  %v708_v61 = vunpack.i.l.bf16 %v707_v59  ;;  %v714_v62 = vunpack.i.h.bf16 %v712_v58  ;;  %v713_v63 = vunpack.i.l.bf16 %v712_v58 }
 0x39c   :  { %v452_v2 = vsel %vm71_vm5, %v427_v1, %v709_v60  ;;  %v484_v4 = vsel %vm71_vm5, %v459_v0, %v708_v61 }
 0x39d   :  { %v717_v5 = vpop.permute.xlu1 %716  ;;  %v485_v8 = vsel %vm262_vm12, %v484_v4, %v713_v63  ;;  %v453_v9 = vsel %vm262_vm12, %v452_v2, %v714_v62  ;;  %v482_v10 = vpop.permute.xlu0 %481 }
 0x39e   :  { %v719_v6 = vunpack.i.h.bf16 %v717_v5  ;;  %v718_v7 = vunpack.i.l.bf16 %v717_v5 }
 0x3a0   :  { %v486_v11 = vsel %vm454_vm3, %v485_v8, %v718_v7  ;;  %v455_v12 = vsel %vm454_vm3, %v453_v9, %v719_v6 }
 0x3a1   :  { %v450_v13 = vpop.permute.xlu1 %449  ;;  %v487_v14 = vsel %vm456_vm4, %v486_v11, %v482_v10 }
 0x3a2   :  { %v457_v15 = vsel %vm456_vm4, %v455_v12, %v450_v13  ;;  %v489_v17 = vrot.slane %v487_v14, 6 }
 0x3a4   :  { %v491_v18 = vsel %vm127_vm0, %v457_v15, %v489_v17 }
 0x3a5   :  { %v492_v19 = vpack.c.bf16 %v491_v18, %v491_v18 }
 0x3a7   :  { %657 = vmatmul.mubr.msk.bf16.vlgmr.msra.gmra.mrb[0].mxu0 %vm540_vm6, %v492_v19 }
 0x47a   :  { %v578_v21 = vpop.f32.mrb[0].mxu0 }
 0x47b   :  { %v579_v22 = vadd.f32 %v608_v20, %v578_v21  ;;  %v658_v23 = vpop.f32.mrb[1].mxu0 }
 0x47c   :  { %v581_v24 = vpop.f32.mrb[2].mxu0 }
 0x47d   :  { %584 = vst [vmem:[%s963_s11] sm:$0xf] %v579_v22  ;;  %v659_v25 = vpop.f32.mrb[3].mxu0 }

</bundles_post_ra>
